<compile_context>
chip_gen: v7x
topology: tpu7x:2x2x1
jax: 0.10.0
libtpu: 0.0.40
codegen_flags: <defaults>
</compile_context>

<pallas_src>
import numpy as np
import jax
import jax.numpy as jnp
from jax import lax
from jax.experimental import pallas as pl
from jax.experimental.pallas import tpu as pltpu

# ----- module hyper-parameters (PyTorch defaults, 'directional' pooling) -----
CELL_SIDE = 2.0
N_GRID = 4                         # n
POOL_SIZE = 8                      # pool_size
SIDE = N_GRID * POOL_SIZE          # 32 fine cells per side
FINE = SIDE * SIDE                 # 1024 fine cells
POOLING_DIM = 2                    # 'directional'
HIDDEN_DIM = 32                    # small hidden dim for the synthetic example
OUT_DIM = HIDDEN_DIM
BLUR_SIZE = 0                      # default: no avg_pool blur
N_COARSE = N_GRID * N_GRID         # 16 coarse cells
OUT_ROWS = POOLING_DIM * N_COARSE  # 32 output rows (channel-major)

MAX_B_BLOCK = 512                  # scenes per grid step (lane-dense output)


def _choose_block(batch):
    """Lane block: multiple of 128, <= MAX_B_BLOCK, and >= 2 grid steps when the
    batch is large enough so ("parallel",) can shard across v7x's two TCs."""
    b = min(MAX_B_BLOCK, pl.cdiv(batch, 128) * 128)
    if batch > 128:
        b = min(b, pl.cdiv(pl.cdiv(batch, 2), 128) * 128)
    return max(128, b)


def _pooling_directional_kernel(obs1_ref, obs2_ref, out_ref):
    # obs refs are (2*A, Bb): rows [0, A) are x per agent, rows [A, 2A) are y,
    # scenes on the lane axis.  Output ref is (32, Bb) channel-major rows.
    o1 = obs1_ref[...]
    o2 = obs2_ref[...]
    A = o2.shape[0] // 2
    Am1 = A - 1
    Bb = o2.shape[1]

    x2 = o2[0:A, :]
    y2 = o2[A:2 * A, :]
    velx = x2 - o1[0:A, :]
    vely = y2 - o1[A:2 * A, :]

    x0 = x2[0:1, :]                          # (1, Bb) agent-0 position at t2
    y0 = y2[0:1, :]
    ox = x2[1:, :]                           # (Am1, Bb) other agents
    oy = y2[1:, :]
    vx = velx[1:, :] - velx[0:1, :]          # (Am1, Bb) relative displacement
    vy = vely[1:, :] - vely[0:1, :]

    # --- fine-grid coordinates & validity masks (lane-parallel) ---
    inv_scale = POOL_SIZE / CELL_SIDE        # 4.0 (exact)
    half = N_GRID * POOL_SIZE / 2.0          # 16.0
    gx = (ox - x0) * inv_scale + half
    gy = (oy - y0) * inv_scale + half

    not_nan_x = (ox == ox)                   # torch: isnan(other_xy[:,0]) == 0
    in_range = (gx >= 0.0) & (gx < float(SIDE)) & (gy >= 0.0) & (gy < float(SIDE))
    validb = not_nan_x & in_range            # (Am1, Bb) bool
    # NOTE: agents with NaN only in y are dropped here; torch would hit an
    # undefined .long() on NaN for that edge case (behavior diverges only on UB).

    # sanitize so int conversion is defined; valid lanes are already in [0, 32)
    gx_s = jnp.where(validb, gx, 0.0)
    gy_s = jnp.where(validb, gy, 0.0)
    ix = jnp.floor(gx_s).astype(jnp.int32)   # floor == torch .long() for >= 0
    iy = jnp.floor(gy_s).astype(jnp.int32)
    oi = (ix << 5) + iy                              # fine index (SIDE = 32)
    coarse = ((ix >> 3) << 2) + (iy >> 3)            # coarse index (POOL=8, N=4)

    # --- "last write wins" dedup (matches occ[oi] = values scatter):
    # drop agent j if a later *valid* agent k (> j) occupies the same fine cell.
    # Invalid agents get a unique negative sentinel so one compare suffices.
    j_iota = lax.broadcasted_iota(jnp.int32, (Am1, Bb), 0)      # hoisted
    oi_d = jnp.where(validb, oi, -(1 + j_iota))

    later_dup = None
    for k in range(1, Am1):
        conflict = (j_iota < k) & (oi_d == oi_d[k:k + 1, :])
        later_dup = conflict if later_dup is None else (later_dup | conflict)

    keep = validb & (x0 == x0)               # torch: xy[0] != xy[0] -> zeros
    if later_dup is not None:
        keep = keep & jnp.logical_not(later_dup)

    mvx = jnp.where(keep, vx, 0.0)           # (Am1, Bb)
    mvy = jnp.where(keep, vy, 0.0)

    # --- agent-major accumulation into per-channel (16, Bb) coarse grids.
    # Row order of the output = (channel, row, col), matching occ_summed.view(-1).
    row16 = lax.broadcasted_iota(jnp.int32, (N_COARSE, Bb), 0)  # hoisted
    acc_x = jnp.zeros((N_COARSE, Bb), jnp.float32)
    acc_y = jnp.zeros((N_COARSE, Bb), jnp.float32)
    for j in range(Am1):
        hit = row16 == coarse[j:j + 1, :]                        # (16, Bb)
        acc_x = acc_x + jnp.where(hit, mvx[j:j + 1, :], 0.0)
        acc_y = acc_y + jnp.where(hit, mvy[j:j + 1, :], 0.0)

    # two aligned, lane-dense, unmasked stores (rows 0..15 = x, 16..31 = y)
    out_ref[0:N_COARSE, :] = acc_x
    out_ref[N_COARSE:2 * N_COARSE, :] = acc_y


@jax.jit
def pooling_grid_native(o1_cm, o2_cm):
    """Native fast path.  o1_cm, o2_cm: (2A, B) f32 channel-major (rows [0,A)=x,
    rows [A,2A)=y, scenes on the trailing axis).  Returns the (32, B) pooled
    grid channel-major — no layout ops around the kernel."""
    two_a, batch = o2_cm.shape
    if two_a == 2:                           # single agent: torch returns zeros
        return jnp.zeros((OUT_ROWS, batch), jnp.float32)
    blk = _choose_block(batch)
    bp = pl.cdiv(batch, blk) * blk
    o1 = o1_cm if bp == batch else jnp.pad(o1_cm, ((0, 0), (0, bp - batch)))
    o2 = o2_cm if bp == batch else jnp.pad(o2_cm, ((0, 0), (0, bp - batch)))
    out = pl.pallas_call(
        _pooling_directional_kernel,
        out_shape=jax.ShapeDtypeStruct((OUT_ROWS, bp), jnp.float32),
        grid=(bp // blk,),
        in_specs=[pl.BlockSpec((two_a, blk), lambda i: (0, i)),
                  pl.BlockSpec((two_a, blk), lambda i: (0, i))],
        out_specs=pl.BlockSpec((OUT_ROWS, blk), lambda i: (0, i)),
        compiler_params=pltpu.CompilerParams(
            dimension_semantics=("parallel",)),   # v7x: batch split over 2 TCs
    )(o1, o2)
    return out if bp == batch else out[:, :batch]


def to_channel_major(obs):
    """(B, A, 2) torch layout -> (2A, B) channel-major."""
    obs = jnp.asarray(obs, jnp.float32)
    return jnp.transpose(obs, (2, 1, 0)).reshape(-1, obs.shape[0])


def pooling_forward_batched(obs1, obs2):
    """Torch-layout convenience: obs1, obs2 (B, A, 2) -> (B, 32).
    NOTE: the layout conversion and final transpose are extra XLA HBM passes
    around the tiny kernel; performance-critical callers should keep data in
    (2A, B) layout and use pooling_grid_native directly."""
    return pooling_grid_native(to_channel_major(obs1), to_channel_major(obs2)).T


def pooling_forward(hidden_state, obs1, obs2):
    """Pooling.forward for type_='directional' (hidden_state unused, as in torch).
    obs1, obs2: (A, 2) single scene -> (1, 32) grid."""
    del hidden_state
    o1 = to_channel_major(jnp.asarray(obs1, jnp.float32)[None])
    o2 = to_channel_major(jnp.asarray(obs2, jnp.float32)[None])
    return pooling_grid_native(o1, o2).T


def init_embedding_params(key):
    # nn.Linear(n*n*pooling_dim, out_dim) declared in __init__ but NOT applied
    # in forward (forward returns the raw grid); initialized here for fidelity.
    in_dim = N_GRID * N_GRID * POOLING_DIM
    k1, k2 = jax.random.split(key)
    bound = 1.0 / np.sqrt(in_dim)
    w = jax.random.uniform(k1, (OUT_DIM, in_dim), minval=-bound, maxval=bound)
    b = jax.random.uniform(k2, (OUT_DIM,), minval=-bound, maxval=bound)
    return w, b


def reference_directional(obs1, obs2):
    """Literal numpy port of the PyTorch scatter + lp_pool path (for checking)."""
    out_dim = N_GRID * N_GRID * POOLING_DIM
    zeros = np.zeros((1, out_dim), np.float32)
    xy = obs2[0]
    other_xy = obs2[1:]
    vel = obs2 - obs1
    other_values = vel[1:] - vel[0]
    if np.isnan(xy[0]):
        return zeros
    mask = ~np.isnan(other_xy[:, 0])
    oxy = other_xy[mask]
    ov = other_values[mask]
    if oxy.shape[0] == 0:
        return zeros
    oij = (oxy - xy) / (CELL_SIDE / POOL_SIZE) + N_GRID * POOL_SIZE / 2
    viol = np.sum((oij < 0) | (oij >= N_GRID * POOL_SIZE), axis=1)
    rng = viol == 0
    oij = oij[rng].astype(np.int64)
    ov = ov[rng]
    if oij.shape[0] == 0:
        return zeros
    oi = oij[:, 0] * SIDE + oij[:, 1]
    occ = np.zeros((FINE, POOLING_DIM), np.float32)
    occ[oi] = ov                                   # last write wins
    occ2d = occ.T.reshape(POOLING_DIM, SIDE, SIDE)
    pooled = occ2d.reshape(POOLING_DIM, N_GRID, POOL_SIZE, N_GRID, POOL_SIZE).sum(axis=(2, 4))
    return pooled.reshape(1, -1).astype(np.float32)


if __name__ == "__main__":
    key = jax.random.PRNGKey(0)
    k1, k2, k3, k4 = jax.random.split(key, 4)

    A = 8     # agent 0 + 7 others
    B = 300   # > 128 so the adaptive block keeps >= 2 grid steps (+ lane padding)
    obs2 = jax.random.uniform(k1, (B, A, 2), minval=-2.0, maxval=2.0, dtype=jnp.float32)
    vel = jax.random.uniform(k2, (B, A, 2), minval=-0.5, maxval=0.5, dtype=jnp.float32)
    obs1 = obs2 - vel

    # Exercise the masking / dedup paths:
    obs2 = obs2.at[0, 3].set(jnp.array([50.0, 50.0], jnp.float32))   # out-of-range agent
    obs1 = obs1.at[0, 3].set(jnp.array([49.5, 49.5], jnp.float32))
    obs2 = obs2.at[0, 5, 0].set(jnp.nan)                             # NaN other agent
    obs2 = obs2.at[1, 0, 0].set(jnp.nan)                             # NaN agent 0 -> zeros
    obs2 = obs2.at[2, 4].set(obs2[2, 2])                             # duplicate fine cell
    obs1 = obs1.at[2, 4].set(obs1[2, 2] + 0.01)                      # distinct value -> last wins

    emb_w, emb_b = init_embedding_params(k3)  # declared in __init__ but unused in forward

    # --- Native path: channel-major inputs, channel-major output, no wrapper transposes.
    o1_cm = to_channel_major(obs1)
    o2_cm = to_channel_major(obs2)
    grids_cm = pooling_grid_native(o1_cm, o2_cm)     # (32, B)
    jax.block_until_ready(grids_cm)
    assert grids_cm.shape == (OUT_ROWS, B)

    grids = np.asarray(grids_cm).T                   # (B, 32) for checking
    obs1_np, obs2_np = np.asarray(obs1), np.asarray(obs2)
    for b in range(B):
        ref_b = reference_directional(obs1_np[b], obs2_np[b])
        np.testing.assert_allclose(grids[b:b + 1], ref_b, rtol=1e-5, atol=1e-5)

    # --- Torch-layout convenience path matches the native path exactly.
    grids2 = pooling_forward_batched(obs1, obs2)
    jax.block_until_ready(grids2)
    np.testing.assert_allclose(np.asarray(grids2), grids, rtol=1e-6, atol=1e-6)

    # --- Module-faithful single-scene forward (torch signature).
    hidden_state = jax.random.normal(k4, (A, HIDDEN_DIM), dtype=jnp.float32)
    g0 = pooling_forward(hidden_state, obs1[0], obs2[0])
    jax.block_until_ready(g0)
    assert g0.shape == (1, OUT_ROWS)
    np.testing.assert_allclose(np.asarray(g0),
                               reference_directional(obs1_np[0], obs2_np[0]),
                               rtol=1e-5, atol=1e-5)
    print("KERNEL_OK")
</pallas_src>

<mosaic_0001>
module attributes {stable_mosaic.version = 11 : i64} {
  func.func @_pooling_directional_kernel(%arg0: i32, %arg1: memref<16x256xf32, #tpu.memory_space<vmem>>, %arg2: memref<16x256xf32, #tpu.memory_space<vmem>>, %arg3: memref<32x256xf32, #tpu.memory_space<vmem>>) attributes {dimension_semantics = [#tpu.dimension_semantics<parallel>], iteration_bounds = array<i64: 2>, scalar_prefetch = 0 : i64, scratch_operands = 0 : i64, tpu.core_type = #tpu.core_type<tc>, window_params = [{transform_indices = @transform_0, window_bounds = array<i64: 16, 256>}, {transform_indices = @transform_1, window_bounds = array<i64: 16, 256>}, {transform_indices = @transform_2, window_bounds = array<i64: 32, 256>}]} {
    %c0 = arith.constant 0 : index
    %c0_0 = arith.constant 0 : index
    %0 = vector.load %arg1[%c0, %c0_0] : memref<16x256xf32, #tpu.memory_space<vmem>>, vector<16x256xf32>
    %c0_1 = arith.constant 0 : index
    %c0_2 = arith.constant 0 : index
    %1 = vector.load %arg2[%c0_1, %c0_2] : memref<16x256xf32, #tpu.memory_space<vmem>>, vector<16x256xf32>
    %2 = vector.extract_strided_slice %1 {offsets = [0, 0], sizes = [8, 256], strides = [1, 1]} : vector<16x256xf32> to vector<8x256xf32>
    %3 = vector.extract_strided_slice %1 {offsets = [8, 0], sizes = [8, 256], strides = [1, 1]} : vector<16x256xf32> to vector<8x256xf32>
    %4 = vector.extract_strided_slice %0 {offsets = [0, 0], sizes = [8, 256], strides = [1, 1]} : vector<16x256xf32> to vector<8x256xf32>
    %5 = arith.subf %2, %4 : vector<8x256xf32>
    %6 = vector.extract_strided_slice %0 {offsets = [8, 0], sizes = [8, 256], strides = [1, 1]} : vector<16x256xf32> to vector<8x256xf32>
    %7 = arith.subf %3, %6 : vector<8x256xf32>
    %8 = vector.extract_strided_slice %2 {offsets = [0, 0], sizes = [1, 256], strides = [1, 1]} : vector<8x256xf32> to vector<1x256xf32>
    %9 = vector.extract_strided_slice %3 {offsets = [0, 0], sizes = [1, 256], strides = [1, 1]} : vector<8x256xf32> to vector<1x256xf32>
    %10 = vector.extract_strided_slice %2 {offsets = [1, 0], sizes = [7, 256], strides = [1, 1]} : vector<8x256xf32> to vector<7x256xf32>
    %11 = vector.extract_strided_slice %3 {offsets = [1, 0], sizes = [7, 256], strides = [1, 1]} : vector<8x256xf32> to vector<7x256xf32>
    %12 = vector.extract_strided_slice %5 {offsets = [1, 0], sizes = [7, 256], strides = [1, 1]} : vector<8x256xf32> to vector<7x256xf32>
    %13 = vector.extract_strided_slice %5 {offsets = [0, 0], sizes = [1, 256], strides = [1, 1]} : vector<8x256xf32> to vector<1x256xf32>
    %14 = vector.broadcast %13 : vector<1x256xf32> to vector<7x256xf32>
    %15 = arith.subf %12, %14 : vector<7x256xf32>
    %16 = vector.extract_strided_slice %7 {offsets = [1, 0], sizes = [7, 256], strides = [1, 1]} : vector<8x256xf32> to vector<7x256xf32>
    %17 = vector.extract_strided_slice %7 {offsets = [0, 0], sizes = [1, 256], strides = [1, 1]} : vector<8x256xf32> to vector<1x256xf32>
    %18 = vector.broadcast %17 : vector<1x256xf32> to vector<7x256xf32>
    %19 = arith.subf %16, %18 : vector<7x256xf32>
    %20 = vector.broadcast %8 : vector<1x256xf32> to vector<7x256xf32>
    %21 = arith.subf %10, %20 : vector<7x256xf32>
    %cst = arith.constant 4.000000e+00 : f32
    %22 = vector.broadcast %cst : f32 to vector<7x256xf32>
    %23 = arith.mulf %21, %22 : vector<7x256xf32>
    %cst_3 = arith.constant 1.600000e+01 : f32
    %24 = vector.broadcast %cst_3 : f32 to vector<7x256xf32>
    %25 = arith.addf %23, %24 : vector<7x256xf32>
    %26 = vector.broadcast %9 : vector<1x256xf32> to vector<7x256xf32>
    %27 = arith.subf %11, %26 : vector<7x256xf32>
    %cst_4 = arith.constant 4.000000e+00 : f32
    %28 = vector.broadcast %cst_4 : f32 to vector<7x256xf32>
    %29 = arith.mulf %27, %28 : vector<7x256xf32>
    %cst_5 = arith.constant 1.600000e+01 : f32
    %30 = vector.broadcast %cst_5 : f32 to vector<7x256xf32>
    %31 = arith.addf %29, %30 : vector<7x256xf32>
    %32 = arith.cmpf oeq, %10, %10 : vector<7x256xf32>
    %cst_6 = arith.constant 0.000000e+00 : f32
    %33 = vector.broadcast %cst_6 : f32 to vector<7x256xf32>
    %34 = arith.cmpf oge, %25, %33 : vector<7x256xf32>
    %cst_7 = arith.constant 3.200000e+01 : f32
    %35 = vector.broadcast %cst_7 : f32 to vector<7x256xf32>
    %36 = arith.cmpf olt, %25, %35 : vector<7x256xf32>
    %37 = arith.andi %34, %36 : vector<7x256xi1>
    %cst_8 = arith.constant 0.000000e+00 : f32
    %38 = vector.broadcast %cst_8 : f32 to vector<7x256xf32>
    %39 = arith.cmpf oge, %31, %38 : vector<7x256xf32>
    %40 = arith.andi %37, %39 : vector<7x256xi1>
    %cst_9 = arith.constant 3.200000e+01 : f32
    %41 = vector.broadcast %cst_9 : f32 to vector<7x256xf32>
    %42 = arith.cmpf olt, %31, %41 : vector<7x256xf32>
    %43 = arith.andi %40, %42 : vector<7x256xi1>
    %44 = arith.andi %32, %43 : vector<7x256xi1>
    %cst_10 = arith.constant 0.000000e+00 : f32
    %45 = vector.broadcast %cst_10 : f32 to vector<7x256xf32>
    %46 = arith.select %44, %25, %45 : vector<7x256xi1>, vector<7x256xf32>
    %cst_11 = arith.constant 0.000000e+00 : f32
    %47 = vector.broadcast %cst_11 : f32 to vector<7x256xf32>
    %48 = arith.select %44, %31, %47 : vector<7x256xi1>, vector<7x256xf32>
    %49 = math.floor %46 : vector<7x256xf32>
    %50 = arith.fptosi %49 : vector<7x256xf32> to vector<7x256xi32>
    %51 = math.floor %48 : vector<7x256xf32>
    %52 = arith.fptosi %51 : vector<7x256xf32> to vector<7x256xi32>
    %c5_i32 = arith.constant 5 : i32
    %53 = vector.broadcast %c5_i32 : i32 to vector<7x256xi32>
    %54 = arith.shli %50, %53 : vector<7x256xi32>
    %55 = arith.addi %54, %52 : vector<7x256xi32>
    %c3_i32 = arith.constant 3 : i32
    %56 = vector.broadcast %c3_i32 : i32 to vector<7x256xi32>
    %57 = arith.shrsi %50, %56 : vector<7x256xi32>
    %c2_i32 = arith.constant 2 : i32
    %58 = vector.broadcast %c2_i32 : i32 to vector<7x256xi32>
    %59 = arith.shli %57, %58 : vector<7x256xi32>
    %c3_i32_12 = arith.constant 3 : i32
    %60 = vector.broadcast %c3_i32_12 : i32 to vector<7x256xi32>
    %61 = arith.shrsi %52, %60 : vector<7x256xi32>
    %62 = arith.addi %59, %61 : vector<7x256xi32>
    %63 = tpu.iota {dimensions = array<i32: 0>} : vector<7x256xi32>
    %c1_i32 = arith.constant 1 : i32
    %64 = vector.broadcast %c1_i32 : i32 to vector<7x256xi32>
    %65 = arith.addi %64, %63 : vector<7x256xi32>
    %c0_i32 = arith.constant 0 : i32
    %66 = vector.broadcast %c0_i32 : i32 to vector<7x256xi32>
    %67 = arith.subi %66, %65 : vector<7x256xi32>
    %68 = arith.select %44, %55, %67 : vector<7x256xi1>, vector<7x256xi32>
    %c1_i32_13 = arith.constant 1 : i32
    %69 = vector.broadcast %c1_i32_13 : i32 to vector<7x256xi32>
    %70 = arith.cmpi slt, %63, %69 : vector<7x256xi32>
    %71 = vector.extract_strided_slice %68 {offsets = [1, 0], sizes = [1, 256], strides = [1, 1]} : vector<7x256xi32> to vector<1x256xi32>
    %72 = vector.broadcast %71 : vector<1x256xi32> to vector<7x256xi32>
    %73 = arith.cmpi eq, %68, %72 : vector<7x256xi32>
    %74 = arith.andi %70, %73 : vector<7x256xi1>
    %c2_i32_14 = arith.constant 2 : i32
    %75 = vector.broadcast %c2_i32_14 : i32 to vector<7x256xi32>
    %76 = arith.cmpi slt, %63, %75 : vector<7x256xi32>
    %77 = vector.extract_strided_slice %68 {offsets = [2, 0], sizes = [1, 256], strides = [1, 1]} : vector<7x256xi32> to vector<1x256xi32>
    %78 = vector.broadcast %77 : vector<1x256xi32> to vector<7x256xi32>
    %79 = arith.cmpi eq, %68, %78 : vector<7x256xi32>
    %80 = arith.andi %76, %79 : vector<7x256xi1>
    %81 = arith.ori %74, %80 : vector<7x256xi1>
    %c3_i32_15 = arith.constant 3 : i32
    %82 = vector.broadcast %c3_i32_15 : i32 to vector<7x256xi32>
    %83 = arith.cmpi slt, %63, %82 : vector<7x256xi32>
    %84 = vector.extract_strided_slice %68 {offsets = [3, 0], sizes = [1, 256], strides = [1, 1]} : vector<7x256xi32> to vector<1x256xi32>
    %85 = vector.broadcast %84 : vector<1x256xi32> to vector<7x256xi32>
    %86 = arith.cmpi eq, %68, %85 : vector<7x256xi32>
    %87 = arith.andi %83, %86 : vector<7x256xi1>
    %88 = arith.ori %81, %87 : vector<7x256xi1>
    %c4_i32 = arith.constant 4 : i32
    %89 = vector.broadcast %c4_i32 : i32 to vector<7x256xi32>
    %90 = arith.cmpi slt, %63, %89 : vector<7x256xi32>
    %91 = vector.extract_strided_slice %68 {offsets = [4, 0], sizes = [1, 256], strides = [1, 1]} : vector<7x256xi32> to vector<1x256xi32>
    %92 = vector.broadcast %91 : vector<1x256xi32> to vector<7x256xi32>
    %93 = arith.cmpi eq, %68, %92 : vector<7x256xi32>
    %94 = arith.andi %90, %93 : vector<7x256xi1>
    %95 = arith.ori %88, %94 : vector<7x256xi1>
    %c5_i32_16 = arith.constant 5 : i32
    %96 = vector.broadcast %c5_i32_16 : i32 to vector<7x256xi32>
    %97 = arith.cmpi slt, %63, %96 : vector<7x256xi32>
    %98 = vector.extract_strided_slice %68 {offsets = [5, 0], sizes = [1, 256], strides = [1, 1]} : vector<7x256xi32> to vector<1x256xi32>
    %99 = vector.broadcast %98 : vector<1x256xi32> to vector<7x256xi32>
    %100 = arith.cmpi eq, %68, %99 : vector<7x256xi32>
    %101 = arith.andi %97, %100 : vector<7x256xi1>
    %102 = arith.ori %95, %101 : vector<7x256xi1>
    %c6_i32 = arith.constant 6 : i32
    %103 = vector.broadcast %c6_i32 : i32 to vector<7x256xi32>
    %104 = arith.cmpi slt, %63, %103 : vector<7x256xi32>
    %105 = vector.extract_strided_slice %68 {offsets = [6, 0], sizes = [1, 256], strides = [1, 1]} : vector<7x256xi32> to vector<1x256xi32>
    %106 = vector.broadcast %105 : vector<1x256xi32> to vector<7x256xi32>
    %107 = arith.cmpi eq, %68, %106 : vector<7x256xi32>
    %108 = arith.andi %104, %107 : vector<7x256xi1>
    %109 = arith.ori %102, %108 : vector<7x256xi1>
    %110 = arith.cmpf oeq, %8, %8 : vector<1x256xf32>
    %111 = vector.broadcast %110 : vector<1x256xi1> to vector<7x256xi1>
    %112 = arith.andi %44, %111 : vector<7x256xi1>
    %cst_17 = arith.constant dense<true> : vector<7x256xi1>
    %113 = arith.xori %109, %cst_17 : vector<7x256xi1>
    %114 = arith.andi %112, %113 : vector<7x256xi1>
    %cst_18 = arith.constant 0.000000e+00 : f32
    %115 = vector.broadcast %cst_18 : f32 to vector<7x256xf32>
    %116 = arith.select %114, %15, %115 : vector<7x256xi1>, vector<7x256xf32>
    %cst_19 = arith.constant 0.000000e+00 : f32
    %117 = vector.broadcast %cst_19 : f32 to vector<7x256xf32>
    %118 = arith.select %114, %19, %117 : vector<7x256xi1>, vector<7x256xf32>
    %119 = tpu.iota {dimensions = array<i32: 0>} : vector<16x256xi32>
    %cst_20 = arith.constant 0.000000e+00 : f32
    %120 = vector.broadcast %cst_20 : f32 to vector<16x256xf32>
    %cst_21 = arith.constant 0.000000e+00 : f32
    %121 = vector.broadcast %cst_21 : f32 to vector<16x256xf32>
    %122 = vector.extract_strided_slice %62 {offsets = [0, 0], sizes = [1, 256], strides = [1, 1]} : vector<7x256xi32> to vector<1x256xi32>
    %123 = vector.broadcast %122 : vector<1x256xi32> to vector<16x256xi32>
    %124 = arith.cmpi eq, %119, %123 : vector<16x256xi32>
    %125 = vector.extract_strided_slice %116 {offsets = [0, 0], sizes = [1, 256], strides = [1, 1]} : vector<7x256xf32> to vector<1x256xf32>
    %cst_22 = arith.constant 0.000000e+00 : f32
    %126 = vector.shape_cast %125 : vector<1x256xf32> to vector<1x256xf32>
    %127 = vector.broadcast %126 : vector<1x256xf32> to vector<16x256xf32>
    %128 = vector.broadcast %cst_22 : f32 to vector<16x256xf32>
    %129 = arith.select %124, %127, %128 : vector<16x256xi1>, vector<16x256xf32>
    %130 = arith.addf %120, %129 : vector<16x256xf32>
    %131 = vector.extract_strided_slice %118 {offsets = [0, 0], sizes = [1, 256], strides = [1, 1]} : vector<7x256xf32> to vector<1x256xf32>
    %cst_23 = arith.constant 0.000000e+00 : f32
    %132 = vector.shape_cast %131 : vector<1x256xf32> to vector<1x256xf32>
    %133 = vector.broadcast %132 : vector<1x256xf32> to vector<16x256xf32>
    %134 = vector.broadcast %cst_23 : f32 to vector<16x256xf32>
    %135 = arith.select %124, %133, %134 : vector<16x256xi1>, vector<16x256xf32>
    %136 = arith.addf %121, %135 : vector<16x256xf32>
    %137 = vector.extract_strided_slice %62 {offsets = [1, 0], sizes = [1, 256], strides = [1, 1]} : vector<7x256xi32> to vector<1x256xi32>
    %138 = vector.broadcast %137 : vector<1x256xi32> to vector<16x256xi32>
    %139 = arith.cmpi eq, %119, %138 : vector<16x256xi32>
    %140 = vector.extract_strided_slice %116 {offsets = [1, 0], sizes = [1, 256], strides = [1, 1]} : vector<7x256xf32> to vector<1x256xf32>
    %cst_24 = arith.constant 0.000000e+00 : f32
    %141 = vector.shape_cast %140 : vector<1x256xf32> to vector<1x256xf32>
    %142 = vector.broadcast %141 : vector<1x256xf32> to vector<16x256xf32>
    %143 = vector.broadcast %cst_24 : f32 to vector<16x256xf32>
    %144 = arith.select %139, %142, %143 : vector<16x256xi1>, vector<16x256xf32>
    %145 = arith.addf %130, %144 : vector<16x256xf32>
    %146 = vector.extract_strided_slice %118 {offsets = [1, 0], sizes = [1, 256], strides = [1, 1]} : vector<7x256xf32> to vector<1x256xf32>
    %cst_25 = arith.constant 0.000000e+00 : f32
    %147 = vector.shape_cast %146 : vector<1x256xf32> to vector<1x256xf32>
    %148 = vector.broadcast %147 : vector<1x256xf32> to vector<16x256xf32>
    %149 = vector.broadcast %cst_25 : f32 to vector<16x256xf32>
    %150 = arith.select %139, %148, %149 : vector<16x256xi1>, vector<16x256xf32>
    %151 = arith.addf %136, %150 : vector<16x256xf32>
    %152 = vector.extract_strided_slice %62 {offsets = [2, 0], sizes = [1, 256], strides = [1, 1]} : vector<7x256xi32> to vector<1x256xi32>
    %153 = vector.broadcast %152 : vector<1x256xi32> to vector<16x256xi32>
    %154 = arith.cmpi eq, %119, %153 : vector<16x256xi32>
    %155 = vector.extract_strided_slice %116 {offsets = [2, 0], sizes = [1, 256], strides = [1, 1]} : vector<7x256xf32> to vector<1x256xf32>
    %cst_26 = arith.constant 0.000000e+00 : f32
    %156 = vector.shape_cast %155 : vector<1x256xf32> to vector<1x256xf32>
    %157 = vector.broadcast %156 : vector<1x256xf32> to vector<16x256xf32>
    %158 = vector.broadcast %cst_26 : f32 to vector<16x256xf32>
    %159 = arith.select %154, %157, %158 : vector<16x256xi1>, vector<16x256xf32>
    %160 = arith.addf %145, %159 : vector<16x256xf32>
    %161 = vector.extract_strided_slice %118 {offsets = [2, 0], sizes = [1, 256], strides = [1, 1]} : vector<7x256xf32> to vector<1x256xf32>
    %cst_27 = arith.constant 0.000000e+00 : f32
    %162 = vector.shape_cast %161 : vector<1x256xf32> to vector<1x256xf32>
    %163 = vector.broadcast %162 : vector<1x256xf32> to vector<16x256xf32>
    %164 = vector.broadcast %cst_27 : f32 to vector<16x256xf32>
    %165 = arith.select %154, %163, %164 : vector<16x256xi1>, vector<16x256xf32>
    %166 = arith.addf %151, %165 : vector<16x256xf32>
    %167 = vector.extract_strided_slice %62 {offsets = [3, 0], sizes = [1, 256], strides = [1, 1]} : vector<7x256xi32> to vector<1x256xi32>
    %168 = vector.broadcast %167 : vector<1x256xi32> to vector<16x256xi32>
    %169 = arith.cmpi eq, %119, %168 : vector<16x256xi32>
    %170 = vector.extract_strided_slice %116 {offsets = [3, 0], sizes = [1, 256], strides = [1, 1]} : vector<7x256xf32> to vector<1x256xf32>
    %cst_28 = arith.constant 0.000000e+00 : f32
    %171 = vector.shape_cast %170 : vector<1x256xf32> to vector<1x256xf32>
    %172 = vector.broadcast %171 : vector<1x256xf32> to vector<16x256xf32>
    %173 = vector.broadcast %cst_28 : f32 to vector<16x256xf32>
    %174 = arith.select %169, %172, %173 : vector<16x256xi1>, vector<16x256xf32>
    %175 = arith.addf %160, %174 : vector<16x256xf32>
    %176 = vector.extract_strided_slice %118 {offsets = [3, 0], sizes = [1, 256], strides = [1, 1]} : vector<7x256xf32> to vector<1x256xf32>
    %cst_29 = arith.constant 0.000000e+00 : f32
    %177 = vector.shape_cast %176 : vector<1x256xf32> to vector<1x256xf32>
    %178 = vector.broadcast %177 : vector<1x256xf32> to vector<16x256xf32>
    %179 = vector.broadcast %cst_29 : f32 to vector<16x256xf32>
    %180 = arith.select %169, %178, %179 : vector<16x256xi1>, vector<16x256xf32>
    %181 = arith.addf %166, %180 : vector<16x256xf32>
    %182 = vector.extract_strided_slice %62 {offsets = [4, 0], sizes = [1, 256], strides = [1, 1]} : vector<7x256xi32> to vector<1x256xi32>
    %183 = vector.broadcast %182 : vector<1x256xi32> to vector<16x256xi32>
    %184 = arith.cmpi eq, %119, %183 : vector<16x256xi32>
    %185 = vector.extract_strided_slice %116 {offsets = [4, 0], sizes = [1, 256], strides = [1, 1]} : vector<7x256xf32> to vector<1x256xf32>
    %cst_30 = arith.constant 0.000000e+00 : f32
    %186 = vector.shape_cast %185 : vector<1x256xf32> to vector<1x256xf32>
    %187 = vector.broadcast %186 : vector<1x256xf32> to vector<16x256xf32>
    %188 = vector.broadcast %cst_30 : f32 to vector<16x256xf32>
    %189 = arith.select %184, %187, %188 : vector<16x256xi1>, vector<16x256xf32>
    %190 = arith.addf %175, %189 : vector<16x256xf32>
    %191 = vector.extract_strided_slice %118 {offsets = [4, 0], sizes = [1, 256], strides = [1, 1]} : vector<7x256xf32> to vector<1x256xf32>
    %cst_31 = arith.constant 0.000000e+00 : f32
    %192 = vector.shape_cast %191 : vector<1x256xf32> to vector<1x256xf32>
    %193 = vector.broadcast %192 : vector<1x256xf32> to vector<16x256xf32>
    %194 = vector.broadcast %cst_31 : f32 to vector<16x256xf32>
    %195 = arith.select %184, %193, %194 : vector<16x256xi1>, vector<16x256xf32>
    %196 = arith.addf %181, %195 : vector<16x256xf32>
    %197 = vector.extract_strided_slice %62 {offsets = [5, 0], sizes = [1, 256], strides = [1, 1]} : vector<7x256xi32> to vector<1x256xi32>
    %198 = vector.broadcast %197 : vector<1x256xi32> to vector<16x256xi32>
    %199 = arith.cmpi eq, %119, %198 : vector<16x256xi32>
    %200 = vector.extract_strided_slice %116 {offsets = [5, 0], sizes = [1, 256], strides = [1, 1]} : vector<7x256xf32> to vector<1x256xf32>
    %cst_32 = arith.constant 0.000000e+00 : f32
    %201 = vector.shape_cast %200 : vector<1x256xf32> to vector<1x256xf32>
    %202 = vector.broadcast %201 : vector<1x256xf32> to vector<16x256xf32>
    %203 = vector.broadcast %cst_32 : f32 to vector<16x256xf32>
    %204 = arith.select %199, %202, %203 : vector<16x256xi1>, vector<16x256xf32>
    %205 = arith.addf %190, %204 : vector<16x256xf32>
    %206 = vector.extract_strided_slice %118 {offsets = [5, 0], sizes = [1, 256], strides = [1, 1]} : vector<7x256xf32> to vector<1x256xf32>
    %cst_33 = arith.constant 0.000000e+00 : f32
    %207 = vector.shape_cast %206 : vector<1x256xf32> to vector<1x256xf32>
    %208 = vector.broadcast %207 : vector<1x256xf32> to vector<16x256xf32>
    %209 = vector.broadcast %cst_33 : f32 to vector<16x256xf32>
    %210 = arith.select %199, %208, %209 : vector<16x256xi1>, vector<16x256xf32>
    %211 = arith.addf %196, %210 : vector<16x256xf32>
    %212 = vector.extract_strided_slice %62 {offsets = [6, 0], sizes = [1, 256], strides = [1, 1]} : vector<7x256xi32> to vector<1x256xi32>
    %213 = vector.broadcast %212 : vector<1x256xi32> to vector<16x256xi32>
    %214 = arith.cmpi eq, %119, %213 : vector<16x256xi32>
    %215 = vector.extract_strided_slice %116 {offsets = [6, 0], sizes = [1, 256], strides = [1, 1]} : vector<7x256xf32> to vector<1x256xf32>
    %cst_34 = arith.constant 0.000000e+00 : f32
    %216 = vector.shape_cast %215 : vector<1x256xf32> to vector<1x256xf32>
    %217 = vector.broadcast %216 : vector<1x256xf32> to vector<16x256xf32>
    %218 = vector.broadcast %cst_34 : f32 to vector<16x256xf32>
    %219 = arith.select %214, %217, %218 : vector<16x256xi1>, vector<16x256xf32>
    %220 = arith.addf %205, %219 : vector<16x256xf32>
    %221 = vector.extract_strided_slice %118 {offsets = [6, 0], sizes = [1, 256], strides = [1, 1]} : vector<7x256xf32> to vector<1x256xf32>
    %cst_35 = arith.constant 0.000000e+00 : f32
    %222 = vector.shape_cast %221 : vector<1x256xf32> to vector<1x256xf32>
    %223 = vector.broadcast %222 : vector<1x256xf32> to vector<16x256xf32>
    %224 = vector.broadcast %cst_35 : f32 to vector<16x256xf32>
    %225 = arith.select %214, %223, %224 : vector<16x256xi1>, vector<16x256xf32>
    %226 = arith.addf %211, %225 : vector<16x256xf32>
    %c0_36 = arith.constant 0 : index
    %c0_37 = arith.constant 0 : index
    %227 = vector.load %arg3[%c0_36, %c0_37] : memref<32x256xf32, #tpu.memory_space<vmem>>, vector<16x256xf32>
    tpu.vector_store %arg3[%c0_36, %c0_37], %220 {strides = array<i32>} : memref<32x256xf32, #tpu.memory_space<vmem>>, vector<16x256xf32>,
    %c16 = arith.constant 16 : index
    %c0_38 = arith.constant 0 : index
    %228 = vector.load %arg3[%c16, %c0_38] : memref<32x256xf32, #tpu.memory_space<vmem>>, vector<16x256xf32>
    tpu.vector_store %arg3[%c16, %c0_38], %226 {strides = array<i32>} : memref<32x256xf32, #tpu.memory_space<vmem>>, vector<16x256xf32>,
    return
  }
  func.func @transform_0(%arg0: i32) -> (i32, i32) {
    %c0_i32 = arith.constant 0 : i32
    %c0_i32_0 = arith.constant 0 : i32
    return %c0_i32, %arg0 : i32, i32
  }
  func.func @transform_1(%arg0: i32) -> (i32, i32) {
    %c0_i32 = arith.constant 0 : i32
    %c0_i32_0 = arith.constant 0 : i32
    return %c0_i32, %arg0 : i32, i32
  }
  func.func @transform_2(%arg0: i32) -> (i32, i32) {
    %c0_i32 = arith.constant 0 : i32
    %c0_i32_0 = arith.constant 0 : i32
    return %c0_i32, %arg0 : i32, i32
  }
}

</mosaic_0001>

<bundles_post_ra>
// kernel: pooling_grid_native.1
= control target key start
LH: loop header
LB: loop body
LE: loop exit
PB: predicated region body
PF: predicated region fallthrough
CT: control target
= control target key end

     0   :  { %s1003_s9 = smov 0   ;;  %s1005_s10 = smov 0   ;;  %s1736_s0 = inlined_call_operand.vmem [shape: f32[16,512], index: 0, kind: input, shape index: {}]   ;;  %s1737_s1 = inlined_call_operand.vmem [shape: f32[16,512], index: 1, kind: input, shape index: {}]   ;;  %s1738_s2 = inlined_call_operand.vmem [shape: f32[32,512], index: 2, kind: output, shape index: {}]  }
   0x1   :  { %s1007_s11 = smov 0  }
   0x2 LB: > { %s906_s12 = sadd.s32 4294967295, %s984_s11   ;;  %s1020_s13 = sadd.s32 1, %s984_s11   ;;  %s984_s11 = sphi %s1007_s11, %s1833_s11   ;;  %s980_s10 = sphi %s1005_s10, %s1832_s10   ;;  %s976_s9 = sphi %s1003_s9, %s1831_s9  }
   0x3   : > { %s16_s14 = ssub.s32 %s984_s11, %s1020_s13  ;;  %s19_s15 = sadd.s32 1, %s980_s10 }
   0x4   : > { %p17_p0 = scmp.eq.s32.totalorder %s16_s14, 0  ;;  %p26_p1 = scmp.ne.s32.totalorder %s980_s10, %s976_s9 }
   0x5   : > { %p27_p2 = scmp.eq.s32.totalorder %s984_s11, 0  ;;  %p82_p3 = scmp.eq.s32.totalorder %s906_s12, 1 }
   0x6   : > { %s1031_s16 = scalar_select %p17_p0, %s980_s10, %s19_s15  }
   0x7   : > { %p1033_p4 = por %p27_p2, %p26_p1  ;;  %p1037_p5 = por %p82_p3, %p26_p1 }
   0x8   : > { %p909_p6 = scmp.ge.s32.totalorder %s984_s11, 2 }
   0xa   : > { %104 = sbr.rel (%p909_p6) target bundleno = 31 (0x1f), region = 16 }
  0x11   : > { %107 = sbr.rel (!%p1033_p4) target bundleno = 24 (0x18), region = 20  ;;  %s109_s19 = sand.u32 (%p1033_p4), 1, %s980_s10  }
  0x12   : > { %s925_s20 = sshll.u32 (%p1033_p4), %s984_s11, 4  ;;  %s910_s21 = sshll.u32 (%p1033_p4), %s109_s19, 5 }
  0x13   : > { %s114_s24 = scalar_lea.vmem (%p1033_p4), %s1736_s0, %s925_s20  ;;  %s111_s25 = scalar_lea.vmem (%p1033_p4), [#allocation2], %s910_s21 }
  0x14   : > { %v127_v0 = vld [vmem:[%s114_s24] sm:$0xff] (%p1033_p4)  ;;  %v129_v1 = vld [vmem:[%s114_s24 + $0x8] sm:$0xff] (%p1033_p4) }
  0x15   : > { %v131_v2 = vld [vmem:[%s114_s24 + $0x20] sm:$0xff] (%p1033_p4)  ;;  %128 = vst [vmem:[%s111_s25] sm:$0xff] (%p1033_p4), %v127_v0  ;;  %130 = vst [vmem:[%s111_s25 + $0x8] sm:$0xff] (%p1033_p4), %v129_v1  ;;  %v133_v3 = vld [vmem:[%s114_s24 + $0x28] sm:$0xff] (%p1033_p4) }
  0x16   : > { %132 = vst [vmem:[%s111_s25 + $0x10] sm:$0xff] (%p1033_p4), %v131_v2  ;;  %134 = vst [vmem:[%s111_s25 + $0x18] sm:$0xff] (%p1033_p4), %v133_v3 }
  0x18 PF: > { %140 = sbr.rel (!%p1033_p4) target bundleno = 31 (0x1f), region = 43  ;;  %s142_s26 = sand.u32 (%p1033_p4), 1, %s980_s10  }
  0x19   : > { %s926_s27 = sshll.u32 (%p1033_p4), %s984_s11, 4  ;;  %s913_s28 = sshll.u32 (%p1033_p4), %s142_s26, 5 }
  0x1a   : > { %s147_s3 = scalar_lea.vmem (%p1033_p4), %s1737_s1, %s926_s27  ;;  %s144_s4 = scalar_lea.vmem (%p1033_p4), [#allocation3], %s913_s28 }
  0x1b   : > { %v160_v4 = vld [vmem:[%s147_s3] sm:$0xff] (%p1033_p4)  ;;  %v162_v5 = vld [vmem:[%s147_s3 + $0x8] sm:$0xff] (%p1033_p4) }
  0x1c   : > { %v164_v6 = vld [vmem:[%s147_s3 + $0x20] sm:$0xff] (%p1033_p4)  ;;  %161 = vst [vmem:[%s144_s4] sm:$0xff] (%p1033_p4), %v160_v4  ;;  %163 = vst [vmem:[%s144_s4 + $0x8] sm:$0xff] (%p1033_p4), %v162_v5  ;;  %v166_v7 = vld [vmem:[%s147_s3 + $0x28] sm:$0xff] (%p1033_p4) }
  0x1d   : > { %165 = vst [vmem:[%s144_s4 + $0x10] sm:$0xff] (%p1033_p4), %v164_v6  ;;  %167 = vst [vmem:[%s144_s4 + $0x18] sm:$0xff] (%p1033_p4), %v166_v7 }
  0x1f PF: > { %p916_p7 = scmp.ge.s32.totalorder %s984_s11, 1  ;;  %p172_p8 = scmp.lt.s32.totalorder %s984_s11, 3 }
  0x21   : > { %p173_p9 = pnand %p916_p7, %p172_p8 }
  0x22   : > { %s179_s5 = sand.u32 (!%p173_p9), 1, %s976_s9   ;;  %v225_v8 = vlaneseq (!%p173_p9)  ;;  %v986_v54 = vmov (!%p173_p9), 0  }
  0x23   : > { %176 = sbr.rel (%p173_p9) target bundleno = 150 (0x96), region = 66  ;;  %s917_s6 = sshll.u32 (!%p173_p9), %s179_s5, 5 }
  0x24   : > { %v1061_v9 = vshrl.u32 (!%p173_p9), %v225_v8, 7  ;;  %s188_s7 = scalar_lea.vmem (!%p173_p9), [#allocation3], %s917_s6  ;;  %s1088_s8 = scalar_lea.vmem (!%p173_p9), [#allocation2], %s917_s6 }
  0x25   : > { %v1063_v10 = vld [vmem:[%s188_s7] sm:$0xff] (!%p173_p9)  ;;  %v1065_v11 = vld [vmem:[%s188_s7 + $0x8] sm:$0xff] (!%p173_p9)  ;;  %v1067_v12 = vld [vmem:[%s188_s7 + $0x10] sm:$0xff] (!%p173_p9)  ;;  %s919_s14 = sshll.u32 (!%p173_p9), %s179_s5, 6 }
  0x26   : > { %v1069_v13 = vld [vmem:[%s188_s7 + $0x18] sm:$0xff] (!%p173_p9)  ;;  %v1072_v14 = vsub.s32 (!%p173_p9), 0, %v1061_v9  ;;  %vm273_vm4 = vcmp.eq.f32.partialorder (!%p173_p9), %v1063_v10, %v1063_v10  ;;  %v213_v31 = vld [vmem:[%s1088_s8] sm:$0xff] (!%p173_p9)  ;;  %v317_v33 = vadd.s32 (!%p173_p9), 1, %v1061_v9  ;;  %vm274_vm13 = vcmp.eq.f32.partialorder (!%p173_p9), %v1065_v11, %v1065_v11  ;;  %v214_v42 = vld [vmem:[%s1088_s8 + $0x8] sm:$0xff] (!%p173_p9)  ;;  %s1562_s9 = scalar_lea.vmem (!%p173_p9), [#allocation4], %s919_s14 }
  0x27   : > { %v221_v34 = vsub.f32 (!%p173_p9), %v1063_v10, %v213_v31  ;;  %v1118_v48 = vsub.s32 (!%p173_p9), 2, %v1061_v9  ;;  %v1121_v49 = vsub.s32 (!%p173_p9), 3, %v1061_v9  ;;  %v1124_v50 = vsub.f32 (!%p173_p9), %v1065_v11, %v214_v42  ;;  %v215_v61 = vld [vmem:[%s1088_s8 + $0x10] sm:$0xff] (!%p173_p9) }
  0x28   : > { %v248_v15 = vrot.slane (!%p173_p9), %v1063_v10, %v1072_v14  ;;  %v252_v16 = vrot.slane (!%p173_p9), %v1065_v11, %v1072_v14  ;;  %v262_v17 = vrot.slane (!%p173_p9), %v1067_v12, %v1072_v14  ;;  %v266_v18 = vrot.slane (!%p173_p9), %v1069_v13, %v1072_v14 }
  0x29   : > { %v318_v41 = vsub.s32 (!%p173_p9), 0, %v317_v33  ;;  %v228_v43 = vrot.slane (!%p173_p9), %v221_v34, %v1072_v14  ;;  %v1134_v55 = vsel (!%p173_p9), %vm273_vm4, 1, %v986_v54  ;;  %v1140_v58 = vsub.s32 (!%p173_p9), 4, %v1061_v9 }
  0x2a   : > { %v253_v19 = vsub.f32 %v1063_v10, %v248_v15  ;;  %v254_v20 = vsub.f32 %v1065_v11, %v252_v16  ;;  %v267_v21 = vsub.f32 %v1067_v12, %v262_v17  ;;  %v268_v22 = vsub.f32 %v1069_v13, %v266_v18  ;;  %s927_s15 = sshll.u32 (%p1037_p5), %s906_s12, 4 }
  0x2b   : > { %v1128_v53 = vrot.slane %v318_v41, 7  ;;  %v1136_v57 = vsub.f32 %v221_v34, %v228_v43  ;;  %v1143_v59 = vsub.s32 5, %v1061_v9  ;;  %v1146_v60 = vsub.s32 6, %v1061_v9  ;;  %s800_s20 = scalar_lea.vmem (%p1037_p5), %s1738_s2, %s927_s15 }
  0x2c   : > { %v255_v23 = vmul.f32 4.0, %v253_v19  ;;  %v256_v24 = vmul.f32 4.0, %v254_v20  ;;  %v269_v25 = vmul.f32 4.0, %v267_v21  ;;  %v270_v26 = vmul.f32 4.0, %v268_v22  ;;  %v216_v22 = vld [vmem:[%s1088_s8 + $0x18] sm:$0xff] }
  0x2d   : > { %v1151_v0 = vsub.s32 7, %v1061_v9  ;;  %v451_v2 = vrot.slane %v1134_v55, %v1072_v14  ;;  %v1156_v3 = vsub.s32 1, %v1061_v9  ;;  %v232_v4 = vrot.slane %v1124_v50, %v1072_v14 }
  0x2e   : > { %v257_v27 = vadd.f32 16.0, %v255_v23  ;;  %v271_v28 = vadd.f32 16.0, %v269_v25  ;;  %v258_v29 = vadd.f32 16.0, %v256_v24  ;;  %v272_v30 = vadd.f32 16.0, %v270_v26 }
  0x2f   : > { %v1164_v5 = vsel %vm274_vm13, 1, %v986_v54  ;;  %v223_v10 = vsub.f32 %v1067_v12, %v215_v61  ;;  %v1206_v41 = vsub.f32 %v1124_v50, %v232_v4 }
  0x30   : > { %vm275_vm0 = vcmp.ge.f32.partialorder %v257_v27, 0.0  ;;  %vm277_vm1 = vcmp.lt.f32.partialorder %v257_v27, 32.0  ;;  %vm281_vm2 = vcmp.ge.f32.partialorder %v271_v28, 0.0  ;;  %vm285_vm3 = vcmp.lt.f32.partialorder %v271_v28, 32.0 }
  0x31   : > { %vm279_vm5 = vmand %vm275_vm0, %vm277_vm1  ;;  %vm276_vm8 = vcmp.ge.f32.partialorder %v258_v29, 0.0  ;;  %vm278_vm9 = vcmp.lt.f32.partialorder %v258_v29, 32.0  ;;  %vm282_vm11 = vcmp.ge.f32.partialorder %v272_v30, 0.0  ;;  %vm286_vm12 = vcmp.lt.f32.partialorder %v272_v30, 32.0 }
  0x32   : > { %vm283_vm6 = vmand %vm279_vm5, %vm281_vm2  ;;  %vm322_vm2 = vcmp.lt.s32.totalorder %v1061_v9, 1  ;;  %vm1740_vm5 = vcmp.lt.s32.totalorder %v1061_v9, 4  ;;  %v238_v34 = vrot.slane %v223_v10, %v1072_v14 }
  0x33   : > { %vm287_vm7 = vmand %vm283_vm6, %vm285_vm3  ;;  %vm341_vm3 = vcmp.lt.s32.totalorder %v1061_v9, 2 }
  0x34   : > { %vm1094_vm10 = vmand %vm273_vm4, %vm287_vm7  ;;  %vm1741_vm4 = vcmp.lt.s32.totalorder %v1061_v9, 3 }
  0x35   : > { %v291_v35 = vsel %vm1094_vm10, %v257_v27, 0.0  ;;  %v293_v36 = vsel %vm1094_vm10, %v271_v28, 0.0  ;;  %vm280_vm14 = vmand %vm276_vm8, %vm278_vm9 }
  0x36   : > { %v295_v37 = vfloor.f32 %v291_v35  ;;  %v299_v38 = vfloor.f32 %v293_v36  ;;  %vm284_vm15 = vmand %vm280_vm14, %vm282_vm11 }
  0x37   : > { %vm288_vm0 = vmand %vm284_vm15, %vm286_vm12 }
  0x38   : > { %v928_v39 = vtrunc.f32 %v295_v37  ;;  %v932_v40 = vtrunc.f32 %v299_v38  ;;  %vm1111_vm1 = vmand %vm274_vm13, %vm288_vm0 }
  0x39   : > { %v292_v47 = vsel %vm1111_vm1, %v258_v29, 0.0  ;;  %v294_v51 = vsel %vm1111_vm1, %v272_v30, 0.0  ;;  %v224_v29 = vsub.f32 %v1069_v13, %v216_v22 }
  0x3a   : > { %v929_v45 = vcvt.f32.s32 %v928_v39  ;;  %v933_v46 = vcvt.f32.s32 %v932_v40  ;;  %v296_v56 = vfloor.f32 %v292_v47  ;;  %v300_v1 = vfloor.f32 %v294_v51 }
  0x3b   : > { %v455_v47 = vrot.slane %v1164_v5, %v1072_v14  ;;  %v1230_v51 = vadd.s32 8, %v1061_v9  ;;  %v242_v55 = vrot.slane %v224_v29, %v1072_v14 }
  0x3c   : > { %v303_v52 = vshll.u32 %v929_v45, 5  ;;  %v307_v63 = vshra.s32 %v929_v45, 3  ;;  %v311_v6 = vshra.s32 %v933_v46, 3  ;;  %v930_v8 = vtrunc.f32 %v296_v56 }
  0x3d   : > { %v934_v21 = vtrunc.f32 %v300_v1  ;;  %v1284_v22 = vsub.f32 %v224_v29, %v242_v55 }
  0x3e   : > { %v305_v62 = vadd.s32 %v933_v46, %v303_v52  ;;  %v309_v18 = vshll.u32 %v307_v63, 2  ;;  %v931_v31 = vcvt.f32.s32 %v930_v8  ;;  %v1232_v52 = vsub.f32 %v223_v10, %v238_v34 }
  0x3f   : > { %v935_v38 = vcvt.f32.s32 %v934_v21 }
  0x40   : > { %v320_v7 = vsel %vm1094_vm10, %v305_v62, %v1128_v53  ;;  %v313_v33 = vadd.s32 %v311_v6, %v309_v18  ;;  %v304_v46 = vshll.u32 %v931_v31, 5  ;;  %v308_v63 = vshra.s32 %v931_v31, 3 }
  0x41   : > { %v326_v15 = vrot.slane %v320_v7, %v1118_v48  ;;  %v345_v16 = vrot.slane %v320_v7, %v1121_v49  ;;  %v366_v17 = vrot.slane %v320_v7, %v1140_v58  ;;  %v387_v11 = vrot.slane %v320_v7, %v1143_v59 }
  0x42   : > { %v408_v19 = vrot.slane %v320_v7, %v1146_v60  ;;  %v429_v20 = vrot.slane %v320_v7, %v1151_v0  ;;  %v1227_v50 = vrot.slane %v313_v33, %v1156_v3  ;;  %v1240_v61 = vrot.slane %v313_v33, %v1118_v48 }
  0x43   : > { %vm331_vm6 = vcmp.eq.s32.totalorder %v320_v7, %v326_v15  ;;  %vm350_vm7 = vcmp.eq.s32.totalorder %v320_v7, %v345_v16  ;;  %vm371_vm8 = vcmp.eq.s32.totalorder %v320_v7, %v366_v17  ;;  %vm392_vm9 = vcmp.eq.s32.totalorder %v320_v7, %v387_v11 }
  0x44   : > { %v333_v12 = vsel %vm331_vm6, 1, %v986_v54  ;;  %v352_v23 = vsel %vm350_vm7, 1, %v986_v54  ;;  %v373_v24 = vsel %vm371_vm8, 1, %v986_v54  ;;  %v394_v25 = vsel %vm392_vm9, 1, %v986_v54 }
  0x45   : > { %v335_v26 = vrot.slane %v333_v12, 1  ;;  %v354_v27 = vrot.slane %v352_v23, 1  ;;  %v375_v28 = vrot.slane %v373_v24, 1  ;;  %v396_v30 = vrot.slane %v394_v25, 1 }
  0x46   : > { %vm413_vm11 = vcmp.eq.s32.totalorder %v320_v7, %v408_v19  ;;  %vm434_vm12 = vcmp.eq.s32.totalorder %v320_v7, %v429_v20  ;;  %vm1739_vm7 = vcmp.lt.s32.totalorder %v1061_v9, 5  ;;  %vm1742_vm8 = vcmp.lt.s32.totalorder %v1061_v9, 6 }
  0x47   : > { %vm337_vm13 = vcmp.ne.s32.totalorder %v335_v26, 0  ;;  %vm356_vm14 = vcmp.ne.s32.totalorder %v354_v27, 0  ;;  %vm1191_vm0 = vcmp.ne.s32.totalorder %v375_v28, 0  ;;  %v415_v13 = vsel %vm413_vm11, 1, %v986_v54 }
  0x48   : > { %vm1187_vm15 = vmand %vm322_vm2, %vm337_vm13  ;;  %v436_v37 = vsel %vm434_vm12, 1, %v986_v54  ;;  %v417_v40 = vrot.slane %v415_v13, 1  ;;  %vm1212_vm11 = vcmp.ne.s32.totalorder %v396_v30, 0  ;;  %vm1216_vm12 = vcmp.eq.s32.totalorder %v451_v2, 1 }
  0x49   : > { %vm1199_vm6 = vmand %vm341_vm3, %vm356_vm14  ;;  %v438_v43 = vrot.slane %v436_v37, 1  ;;  %v306_v62 = vadd.s32 %v935_v38, %v304_v46  ;;  %v1251_v2 = vrot.slane %v313_v33, %v1121_v49  ;;  %v1254_v4 = vrot.slane %v313_v33, %v1140_v58 }
  0x4a   : > { %vm360_vm9 = vmor %vm1187_vm15, %vm1199_vm6  ;;  %vm419_vm15 = vcmp.ne.s32.totalorder %v417_v40, 0  ;;  %v1257_v6 = vrot.slane %v313_v33, %v1143_v59  ;;  %v1260_v7 = vrot.slane %v313_v33, %v1146_v60  ;;  %v310_v8 = vshll.u32 %v308_v63, 2 }
  0x4b   : > { %vm379_vm13 = vmand %vm1741_vm4, %vm1191_vm0  ;;  %v312_v10 = vshra.s32 %v935_v38, 3  ;;  %v321_v15 = vsel %vm1111_vm1, %v306_v62, %v1128_v53  ;;  %v1280_v20 = vrot.slane %v313_v33, %v1151_v0 }
  0x4c   : > { %vm1235_vm14 = vmor %vm360_vm9, %vm379_vm13  ;;  %vm440_vm9 = vcmp.ne.s32.totalorder %v438_v43, 0  ;;  %v330_v16 = vrot.slane %v321_v15, %v1118_v48  ;;  %v349_v17 = vrot.slane %v321_v15, %v1121_v49  ;;  %v370_v11 = vrot.slane %v321_v15, %v1140_v58 }
  0x4d   : > { %vm1246_vm0 = vmand %vm1740_vm5, %vm1212_vm11  ;;  %v391_v18 = vrot.slane %v321_v15, %v1143_v59  ;;  %v412_v53 = vrot.slane %v321_v15, %v1146_v60  ;;  %v433_v21 = vrot.slane %v321_v15, %v1151_v0  ;;  %v314_v27 = vadd.s32 %v312_v10, %v310_v8 }
  0x4e   : > { %vm402_vm6 = vmor %vm1235_vm14, %vm1246_vm0  ;;  %vm372_vm5 = vcmp.eq.s32.totalorder %v321_v15, %v370_v11  ;;  %vm615_vm0 = vcmp.eq.s32.totalorder %v1061_v9, %v1254_v4 }
  0x4f   : > { %vm421_vm11 = vmand %vm1739_vm7, %vm419_vm15  ;;  %vm351_vm7 = vcmp.eq.s32.totalorder %v321_v15, %v349_v17  ;;  %vm393_vm4 = vcmp.eq.s32.totalorder %v321_v15, %v391_v18  ;;  %v374_v25 = vsel %vm372_vm5, 1, %v986_v54  ;;  %vm435_vm5 = vcmp.eq.s32.totalorder %v321_v15, %v433_v21 }
  0x50   : > { %vm1275_vm13 = vmor %vm402_vm6, %vm421_vm11  ;;  %vm332_vm11 = vcmp.eq.s32.totalorder %v321_v15, %v330_v16  ;;  %v353_v24 = vsel %vm351_vm7, 1, %v986_v54  ;;  %v395_v26 = vsel %vm393_vm4, 1, %v986_v54  ;;  %v376_v30 = vrot.slane %v374_v25, 1 }
  0x51   : > { %vm1288_vm14 = vmand %vm1742_vm8, %vm440_vm9  ;;  %v334_v23 = vsel %vm332_vm11, 1, %v986_v54  ;;  %vm1743_vm8 = vmmov 1   ;;  %v355_v29 = vrot.slane %v353_v24, 1  ;;  %v397_v33 = vrot.slane %v395_v26, 1 }
  0x52   : > { %vm444_vm9 = vmor %vm1275_vm13, %vm1288_vm14  ;;  %v336_v28 = vrot.slane %v334_v23, 1  ;;  %vm414_vm4 = vcmp.eq.s32.totalorder %v321_v15, %v412_v53  ;;  %v437_v13 = vsel %vm435_vm5, 1, %v986_v54  ;;  %vm1744_vm7 = vcmp.eq.s32.totalorder %v1230_v51, %v1251_v2 }
  0x53   : > { %vm460_vm6 = vmxor %vm444_vm9, %vm1743_vm8  ;;  %vm357_vm8 = vcmp.ne.s32.totalorder %v355_v29, 0  ;;  %v416_v36 = vsel %vm414_vm4, 1, %v986_v54  ;;  %vm1745_vm11 = vcmp.eq.s32.totalorder %v1230_v51, %v1254_v4  ;;  %vm1746_vm4 = vcmp.eq.s32.totalorder %v1230_v51, %v1257_v6 }
  0x54   : > { %v462_v31 = vsel %vm460_vm6, 1, %v986_v54  ;;  %vm458_vm14 = vmand %vm1094_vm10, %vm1216_vm12  ;;  %vm338_vm9 = vcmp.ne.s32.totalorder %v336_v28, 0  ;;  %v418_v39 = vrot.slane %v416_v36, 1  ;;  %v1362_v43 = vrot.slane %v314_v27, %v1156_v3 }
  0x55   : > { %v464_v34 = vrot.slane %v462_v31, 7  ;;  %vm1326_vm13 = vmand %vm322_vm2, %vm338_vm9  ;;  %vm1342_vm2 = vcmp.ne.s32.totalorder %v376_v30, 0  ;;  %v439_v45 = vrot.slane %v437_v13, 1  ;;  %vm1378_vm12 = vcmp.eq.s32.totalorder %v455_v47, 1 }
  0x56   : > { %vm1338_vm6 = vmand %vm341_vm3, %vm357_vm8  ;;  %vm1357_vm3 = vcmp.ne.s32.totalorder %v397_v33, 0  ;;  %v1383_v55 = vrot.slane %v314_v27, %v1118_v48  ;;  %v1386_v56 = vrot.slane %v314_v27, %v1121_v49  ;;  %v1407_v10 = vrot.slane %v314_v27, %v1140_v58 }
  0x57   : > { %vm466_vm15 = vcmp.ne.s32.totalorder %v464_v34, 0  ;;  %vm361_vm10 = vmor %vm1326_vm13, %vm1338_vm6  ;;  %vm1402_vm6 = vcmp.ne.s32.totalorder %v418_v39, 0  ;;  %vm1788_vm9 = vcmp.eq.s32.totalorder %v1061_v9, %v1227_v50  ;;  %v1426_v19 = vrot.slane %v314_v27, %v1143_v59 }
  0x58   : > { %vm1353_vm5 = vmand %vm458_vm14, %vm466_vm15  ;;  %vm1783_vm15 = vcmp.lt.s32.totalorder %v1061_v9, 3  ;;  %v1429_v53 = vrot.slane %v314_v27, %v1146_v60  ;;  %v1445_v24 = vrot.slane %v314_v27, %v1151_v0 }
  0x59   : > { %v470_v32 = vsel %vm1353_vm5, %v1136_v57, 0.0  ;;  %vm380_vm13 = vmand %vm1783_vm15, %vm1342_vm2  ;;  %vm1789_vm2 = vcmp.eq.s32.totalorder %v1061_v9, %v1240_v61  ;;  %vm1791_vm15 = vcmp.lt.s32.totalorder %v1061_v9, 4 }
  0x5a   : > { %v490_v57 = vrot.slane %v470_v32, %v1156_v3  ;;  %v534_v62 = vrot.slane %v470_v32, %v1118_v48  ;;  %v578_v63 = vrot.slane %v470_v32, %v1121_v49  ;;  %v622_v1 = vrot.slane %v470_v32, %v1140_v58  ;;  %vm1398_vm14 = vmor %vm361_vm10, %vm380_vm13 }
  0x5b   : > { %v666_v14 = vrot.slane %v470_v32, %v1143_v59  ;;  %v710_v5 = vrot.slane %v470_v32, %v1146_v60  ;;  %vm1790_vm10 = vcmp.eq.s32.totalorder %v1061_v9, %v1251_v2  ;;  %v754_v11 = vrot.slane %v470_v32, %v1151_v0  ;;  %vm401_vm13 = vmand %vm1791_vm15, %vm1357_vm3 }
  0x5c   : > { %v495_v15 = vsel %vm1788_vm9, %v490_v57, 0.0  ;;  %v539_v16 = vsel %vm1789_vm2, %v534_v62, 0.0  ;;  %v583_v17 = vsel %vm1790_vm10, %v578_v63, 0.0  ;;  %vm403_vm8 = vmor %vm1398_vm14, %vm401_vm13  ;;  %vm441_vm9 = vcmp.ne.s32.totalorder %v439_v45, 0 }
  0x5d   : > { %v543_v18 = vadd.f32 %v539_v16, %v495_v15  ;;  %v627_v21 = vsel %vm615_vm0, %v622_v1, 0.0  ;;  %vm1792_vm2 = vcmp.eq.s32.totalorder %v1061_v9, %v1257_v6  ;;  %vm1793_vm3 = vcmp.eq.s32.totalorder %v1061_v9, %v1260_v7 }
  0x5e   : > { %v671_v12 = vsel %vm1792_vm2, %v666_v14, 0.0  ;;  %v715_v23 = vsel %vm1793_vm3, %v710_v5, 0.0  ;;  %vm1794_vm14 = vcmp.lt.s32.totalorder %v1061_v9, 5  ;;  %vm1797_vm13 = vcmp.eq.s32.totalorder %v1230_v51, %v1227_v50 }
  0x5f   : > { %vm422_vm10 = vmand %vm1794_vm14, %vm1402_vm6  ;;  %v587_v25 = vadd.f32 %v583_v17, %v543_v18  ;;  %v497_v28 = vsel %vm1797_vm13, %v490_v57, 0.0  ;;  %vm1798_vm2 = vcmp.eq.s32.totalorder %v1230_v51, %v1240_v61  ;;  %v585_v30 = vsel %vm1744_vm7, %v578_v63, 0.0 }
  0x60   : > { %vm1447_vm15 = vmor %vm403_vm8, %vm422_vm10  ;;  %v541_v29 = vsel %vm1798_vm2, %v534_v62, 0.0  ;;  %vm1799_vm6 = vcmp.eq.s32.totalorder %v1061_v9, %v1280_v20  ;;  %vm1800_vm8 = vcmp.lt.s32.totalorder %v1061_v9, 6  ;;  %vm484_vm14 = vcmp.eq.s32.totalorder %v1061_v9, %v1362_v43 }
  0x61   : > { %v759_v27 = vsel %vm1799_vm6, %v754_v11, 0.0  ;;  %vm1465_vm3 = vmand %vm1800_vm8, %vm441_vm9  ;;  %vm528_vm10 = vcmp.eq.s32.totalorder %v1061_v9, %v1383_v55  ;;  %vm572_vm13 = vcmp.eq.s32.totalorder %v1061_v9, %v1386_v56  ;;  %v545_v33 = vadd.f32 %v541_v29, %v497_v28 }
  0x62   : > { %v629_v34 = vsel %vm1745_vm11, %v622_v1, 0.0  ;;  %v631_v35 = vadd.f32 %v627_v21, %v587_v25  ;;  %vm445_vm9 = vmor %vm1447_vm15, %vm1465_vm3  ;;  %v673_v36 = vsel %vm1746_vm4, %v666_v14, 0.0  ;;  %vm1803_vm11 = vcmp.eq.s32.totalorder %v1230_v51, %v1260_v7 }
  0x63   : > { %v717_v13 = vsel %vm1803_vm11, %v710_v5, 0.0  ;;  %vm1804_vm15 = vcmp.eq.s32.totalorder %v1230_v51, %v1280_v20  ;;  %vm1805_vm3 = vmmov 1   ;;  %v589_v38 = vadd.f32 %v585_v30, %v545_v33 }
  0x64   : > { %v761_v37 = vsel %vm1804_vm15, %v754_v11, 0.0  ;;  %vm461_vm6 = vmxor %vm445_vm9, %vm1805_vm3  ;;  %vm486_vm8 = vcmp.eq.s32.totalorder %v1230_v51, %v1362_v43  ;;  %vm530_vm7 = vcmp.eq.s32.totalorder %v1230_v51, %v1383_v55  ;;  %vm574_vm4 = vcmp.eq.s32.totalorder %v1230_v51, %v1386_v56 }
  0x65   : > { %vm618_vm2 = vcmp.eq.s32.totalorder %v1230_v51, %v1407_v10  ;;  %v675_v39 = vadd.f32 %v671_v12, %v631_v35  ;;  %v463_v42 = vsel %vm461_vm6, 1, %v986_v54  ;;  %vm662_vm11 = vcmp.eq.s32.totalorder %v1230_v51, %v1426_v19  ;;  %vm459_vm15 = vmand %vm1111_vm1, %vm1378_vm12 }
  0x66   : > { %vm706_vm9 = vcmp.eq.s32.totalorder %v1230_v51, %v1429_v53  ;;  %v465_v32 = vrot.slane %v463_v42, 7  ;;  %v633_v45 = vadd.f32 %v629_v34, %v589_v38  ;;  %v472_v54 = vsel %vm1353_vm5, %v1232_v52, 0.0 }
  0x67   : > { %v719_v57 = vadd.f32 %v715_v23, %v675_v39  ;;  %v1525_v62 = vrot.slane %v472_v54, %v1156_v3  ;;  %v1528_v63 = vrot.slane %v472_v54, %v1118_v48  ;;  %v1531_v46 = vrot.slane %v472_v54, %v1121_v49 }
  0x68   : > { %vm467_vm1 = vcmp.ne.s32.totalorder %v465_v32, 0  ;;  %v677_v44 = vadd.f32 %v673_v36, %v633_v45  ;;  %v1534_v1 = vrot.slane %v472_v54, %v1140_v58  ;;  %v1537_v14 = vrot.slane %v472_v54, %v1143_v59 }
  0x69   : > { %v763_v40 = vadd.f32 %v759_v27, %v719_v57  ;;  %vm1539_vm5 = vmand %vm459_vm15, %vm467_vm1  ;;  %vm1808_vm12 = vcmp.eq.s32.totalorder %v1061_v9, %v1227_v50  ;;  %vm1809_vm6 = vcmp.eq.s32.totalorder %v1061_v9, %v1240_v61  ;;  %vm1810_vm3 = vcmp.eq.s32.totalorder %v1061_v9, %v1251_v2 }
  0x6a   : > { %v511_v5 = vsel %vm1808_vm12, %v1525_v62, 0.0  ;;  %v555_v47 = vsel %vm1809_vm6, %v1528_v63, 0.0  ;;  %v599_v8 = vsel %vm1810_vm3, %v1531_v46, 0.0  ;;  %v471_v15 = vsel %vm1539_vm5, %v1206_v41, 0.0 }
  0x6b   : > { %v721_v16 = vadd.f32 %v717_v13, %v677_v44  ;;  %v559_v17 = vadd.f32 %v555_v47, %v511_v5  ;;  %v643_v11 = vsel %vm615_vm0, %v1534_v1, 0.0  ;;  %783 = vst [vmem:[%s1562_s9] sm:$0xff] %v763_v40  ;;  %v494_v18 = vrot.slane %v471_v15, %v1156_v3 }
  0x6c   : > { %v538_v21 = vrot.slane %v471_v15, %v1118_v48  ;;  %v582_v12 = vrot.slane %v471_v15, %v1121_v49  ;;  %v626_v41 = vrot.slane %v471_v15, %v1140_v58  ;;  %v670_v23 = vrot.slane %v471_v15, %v1143_v59 }
  0x6d   : > { %v714_v25 = vrot.slane %v471_v15, %v1146_v60  ;;  %v758_v26 = vrot.slane %v471_v15, %v1151_v0  ;;  %v765_v28 = vadd.f32 %v761_v37, %v721_v16  ;;  %v496_v29 = vsel %vm484_vm14, %v494_v18, 0.0 }
  0x6e   : > { %v540_v30 = vsel %vm528_vm10, %v538_v21, 0.0  ;;  %v584_v27 = vsel %vm572_vm13, %v582_v12, 0.0  ;;  %vm1811_vm0 = vcmp.eq.s32.totalorder %v1061_v9, %v1407_v10  ;;  %vm1812_vm15 = vcmp.eq.s32.totalorder %v1061_v9, %v1426_v19 }
  0x6f   : > { %v628_v31 = vsel %vm1811_vm0, %v626_v41, 0.0  ;;  %v544_v33 = vadd.f32 %v540_v30, %v496_v29  ;;  %v672_v34 = vsel %vm1812_vm15, %v670_v23, 0.0  ;;  %vm1813_vm3 = vcmp.eq.s32.totalorder %v1061_v9, %v1429_v53  ;;  %785 = vst [vmem:[%s1562_s9 + $0x10] sm:$0xff] %v765_v28 }
  0x70   : > { %v716_v35 = vsel %vm1813_vm3, %v714_v25, 0.0  ;;  %vm1814_vm1 = vcmp.eq.s32.totalorder %v1061_v9, %v1445_v24  ;;  %v498_v13 = vsel %vm486_vm8, %v494_v18, 0.0  ;;  %v542_v37 = vsel %vm530_vm7, %v538_v21, 0.0 }
  0x71   : > { %v760_v36 = vsel %vm1814_vm1, %v758_v26, 0.0  ;;  %v586_v38 = vsel %vm574_vm4, %v582_v12, 0.0  ;;  %v630_v39 = vsel %vm618_vm2, %v626_v41, 0.0  ;;  %v588_v42 = vadd.f32 %v584_v27, %v544_v33 }
  0x72   : > { %v546_v32 = vadd.f32 %v542_v37, %v498_v13  ;;  %v674_v45 = vsel %vm662_vm11, %v670_v23, 0.0  ;;  %v718_v57 = vsel %vm706_vm9, %v714_v25, 0.0  ;;  %vm1815_vm12 = vcmp.eq.s32.totalorder %v1230_v51, %v1445_v24 }
  0x73   : > { %v762_v44 = vsel %vm1815_vm12, %v758_v26, 0.0  ;;  %v603_v40 = vadd.f32 %v599_v8, %v559_v17  ;;  %vm1816_vm6 = vcmp.eq.s32.totalorder %v1061_v9, %v1257_v6  ;;  %v726_v47 = vrot.slane %v472_v54, %v1146_v60 }
  0x74   : > { %v687_v5 = vsel %vm1816_vm6, %v1537_v14, 0.0  ;;  %v632_v15 = vadd.f32 %v628_v31, %v588_v42  ;;  %v590_v16 = vadd.f32 %v586_v38, %v546_v32  ;;  %v770_v18 = vrot.slane %v472_v54, %v1151_v0 }
  0x75   : > { %v473_v21 = vsel %vm1539_vm5, %v1284_v22, 0.0  ;;  %v647_v12 = vadd.f32 %v643_v11, %v603_v40  ;;  %vm1817_vm0 = vcmp.eq.s32.totalorder %v1061_v9, %v1260_v7  ;;  %vm1818_vm15 = vcmp.eq.s32.totalorder %v1061_v9, %v1280_v20 }
  0x76   : > { %v731_v8 = vsel %vm1817_vm0, %v726_v47, 0.0  ;;  %v510_v17 = vrot.slane %v473_v21, %v1156_v3  ;;  %v554_v41 = vrot.slane %v473_v21, %v1118_v48  ;;  %v676_v23 = vadd.f32 %v672_v34, %v632_v15  ;;  %v817_v53 = vld [vmem:[%s1562_s9 + $0x10] sm:$0xff] (%p1037_p5) }
  0x77   : > { %v634_v25 = vadd.f32 %v630_v39, %v590_v16  ;;  %v775_v26 = vsel %vm1818_vm15, %v770_v18, 0.0  ;;  %v598_v54 = vrot.slane %v473_v21, %v1121_v49  ;;  %v691_v28 = vadd.f32 %v687_v5, %v647_v12  ;;  %818 = vst [vmem:[%s800_s20 + $0x20] sm:$0xff] (%p1037_p5), %v817_v53 }
  0x78   : > { %v512_v22 = vsel %vm484_vm14, %v510_v17, 0.0  ;;  %v556_v52 = vsel %vm528_vm10, %v554_v41, 0.0  ;;  %v642_v3 = vrot.slane %v473_v21, %v1140_v58  ;;  %v720_v48 = vadd.f32 %v716_v35, %v676_v23  ;;  %vm1821_vm10 = vmmov %vm1813_vm3 }
  0x79   : > { %v678_v11 = vadd.f32 %v674_v45, %v634_v25  ;;  %v560_v29 = vadd.f32 %v556_v52, %v512_v22  ;;  %v600_v30 = vsel %vm572_vm13, %v598_v54, 0.0  ;;  %v735_v49 = vadd.f32 %v731_v8, %v691_v28  ;;  %vm1823_vm3 = vmmov %vm1814_vm1 }
  0x7a   : > { %vm1819_vm5 = vcmp.eq.s32.totalorder %v1061_v9, %v1407_v10  ;;  %v686_v31 = vrot.slane %v473_v21, %v1143_v59  ;;  %v730_v33 = vrot.slane %v473_v21, %v1146_v60  ;;  %v764_v34 = vadd.f32 %v760_v36, %v720_v48 }
  0x7b   : > { %v644_v27 = vsel %vm1819_vm5, %v642_v3, 0.0  ;;  %v722_v58 = vadd.f32 %v718_v57, %v678_v11  ;;  %v604_v35 = vadd.f32 %v600_v30, %v560_v29  ;;  %v774_v13 = vrot.slane %v473_v21, %v1151_v0 }
  0x7c   : > { %v779_v37 = vadd.f32 %v775_v26, %v735_v49  ;;  %vm1820_vm14 = vcmp.eq.s32.totalorder %v1061_v9, %v1426_v19  ;;  %v732_v39 = vsel %vm1821_vm10, %v730_v33, 0.0  ;;  %vm1822_vm13 = vcmp.eq.s32.totalorder %v1230_v51, %v1227_v50  ;;  %784 = vst [vmem:[%s1562_s9 + $0x8] sm:$0xff] %v764_v34 }
  0x7d   : > { %v688_v38 = vsel %vm1820_vm14, %v686_v31, 0.0  ;;  %v513_v59 = vsel %vm1822_vm13, %v1525_v62, 0.0  ;;  %v766_v60 = vadd.f32 %v762_v44, %v722_v58  ;;  %v648_v36 = vadd.f32 %v644_v27, %v604_v35 }
  0x7e   : > { %v776_v0 = vsel %vm1823_vm3, %v774_v13, 0.0  ;;  %vm1824_vm1 = vcmp.eq.s32.totalorder %v1230_v51, %v1240_v61  ;;  %787 = vst [vmem:[%s1562_s9 + $0x20] sm:$0xff] %v779_v37  ;;  %vm1825_vm12 = vcmp.eq.s32.totalorder %v1230_v51, %v1251_v2  ;;  %vm1826_vm6 = vcmp.eq.s32.totalorder %v1230_v51, %v1254_v4 }
  0x7f   : > { %v557_v42 = vsel %vm1824_vm1, %v1528_v63, 0.0  ;;  %v601_v50 = vsel %vm1825_vm12, %v1531_v46, 0.0  ;;  %786 = vst [vmem:[%s1562_s9 + $0x18] sm:$0xff] %v766_v60  ;;  %v692_v62 = vadd.f32 %v688_v38, %v648_v36  ;;  %v645_v9 = vsel %vm1826_vm6, %v1534_v1, 0.0 }
  0x80   : > { %v561_v32 = vadd.f32 %v557_v42, %v513_v59  ;;  %v514_v61 = vsel %vm486_vm8, %v510_v17, 0.0  ;;  %v558_v45 = vsel %vm530_vm7, %v554_v41, 0.0  ;;  %v602_v2 = vsel %vm574_vm4, %v598_v54, 0.0 }
  0x81   : > { %v736_v46 = vadd.f32 %v732_v39, %v692_v62  ;;  %vm1827_vm0 = vcmp.eq.s32.totalorder %v1230_v51, %v1257_v6  ;;  %v562_v1 = vadd.f32 %v558_v45, %v514_v61  ;;  %v646_v43 = vsel %vm618_vm2, %v642_v3, 0.0 }
  0x82   : > { %v605_v63 = vadd.f32 %v601_v50, %v561_v32  ;;  %v689_v4 = vsel %vm1827_vm0, %v1537_v14, 0.0  ;;  %vm1828_vm7 = vcmp.eq.s32.totalorder %v1230_v51, %v1260_v7  ;;  %v690_v6 = vsel %vm662_vm11, %v686_v31, 0.0 }
  0x83   : > { %v780_v44 = vadd.f32 %v776_v0, %v736_v46  ;;  %v733_v55 = vsel %vm1828_vm7, %v726_v47, 0.0  ;;  %v606_v56 = vadd.f32 %v602_v2, %v562_v1  ;;  %vm1829_vm4 = vcmp.eq.s32.totalorder %v1230_v51, %v1280_v20  ;;  %v815_v20 = vld [vmem:[%s1562_s9 + $0x8] sm:$0xff] (%p1037_p5) }
  0x84   : > { %v649_v57 = vadd.f32 %v645_v9, %v605_v63  ;;  %v777_v14 = vsel %vm1829_vm4, %v770_v18, 0.0  ;;  %v734_v15 = vsel %vm706_vm9, %v730_v33, 0.0  ;;  %vm1830_vm2 = vcmp.eq.s32.totalorder %v1230_v51, %v1445_v24  ;;  %v813_v51 = vld [vmem:[%s1562_s9] sm:$0xff] (%p1037_p5)  ;;  %816 = vst [vmem:[%s800_s20 + $0x8] sm:$0xff] (%p1037_p5), %v815_v20 }
  0x85   : > { %788 = vst [vmem:[%s1562_s9 + $0x28] sm:$0xff] %v780_v44  ;;  %v650_v10 = vadd.f32 %v646_v43, %v606_v56  ;;  %v778_v47 = vsel %vm1830_vm2, %v774_v13, 0.0  ;;  %v821_v18 = vld [vmem:[%s1562_s9 + $0x20] sm:$0xff] (%p1037_p5)  ;;  %814 = vst [vmem:[%s800_s20] sm:$0xff] (%p1037_p5), %v813_v51 }
  0x86   : > { %v693_v40 = vadd.f32 %v689_v4, %v649_v57  ;;  %v819_v24 = vld [vmem:[%s1562_s9 + $0x18] sm:$0xff] (%p1037_p5)  ;;  %822 = vst [vmem:[%s800_s20 + $0x40] sm:$0xff] (%p1037_p5), %v821_v18 }
  0x87   : > { %v694_v7 = vadd.f32 %v690_v6, %v650_v10  ;;  %797 = sbr.rel (!%p1037_p5) target bundleno = 150 (0x96), region = 78  ;;  %820 = vst [vmem:[%s800_s20 + $0x28] sm:$0xff] (%p1037_p5), %v819_v24 }
  0x88   : > { %v737_v5 = vadd.f32 %v733_v55, %v693_v40 }
  0x89   : > { %v738_v21 = vadd.f32 %v734_v15, %v694_v7 }
  0x8a   : > { %v781_v16 = vadd.f32 %v777_v14, %v737_v5 }
  0x8b   : > { %v782_v19 = vadd.f32 %v778_v47, %v738_v21 }
  0x8c   : > { %789 = vst [vmem:[%s1562_s9 + $0x30] sm:$0xff] %v781_v16  ;;  %v823_v12 = vld [vmem:[%s1562_s9 + $0x28] sm:$0xff] (%p1037_p5) }
  0x8d   : > { %790 = vst [vmem:[%s1562_s9 + $0x38] sm:$0xff] %v782_v19  ;;  %824 = vst [vmem:[%s800_s20 + $0x48] sm:$0xff] (%p1037_p5), %v823_v12 }
  0x93   : > { %v825_v8 = vld [vmem:[%s1562_s9 + $0x30] sm:$0xff] }
  0x94   : > { %v827_v17 = vld [vmem:[%s1562_s9 + $0x38] sm:$0xff]  ;;  %826 = vst [vmem:[%s800_s20 + $0x60] sm:$0xff] %v825_v8 }
  0x95   : > { %828 = vst [vmem:[%s800_s20 + $0x68] sm:$0xff] %v827_v17 }
  0x96 PF: > { %p9_p10 = scmp.ge.s32.totalorder %s1020_s13, 4   ;;  %s1831_s9 = smov %s980_s10 }
  0x97   : > { %s1832_s10 = smov %s1031_s16  ;;  %s1833_s11 = smov %s1020_s13 }
  0x98   :  { %11 = sbr.rel (!%p9_p10) target bundleno = 2 (0x2), region = 140 }

</bundles_post_ra>
